<compile_context>
chip_gen: v5e
topology: v5e:2x2
jax: 0.10.0
libtpu: 0.0.40
codegen_flags: <defaults>
</compile_context>

<pallas_src>
import jax
import jax.numpy as jnp
from jax.experimental import pallas as pl
from jax.experimental.pallas import tpu as pltpu


class Interval:
    """JAX-side mirror of the PyTorch Interval container (lower/upper bounds)."""

    def __init__(self, lower, upper):
        self.lower = lower
        self.upper = upper


def _interval_relu_kernel(lo_ref, up_ref, out_lo_ref, out_up_ref):
    # Elementwise ReLU on both bounds (pure VPU work on one VMEM tile each).
    zero = jnp.zeros((), dtype=lo_ref.dtype)  # dtype-matched zero (no f32 promotion)
    out_lo_ref[...] = jnp.maximum(lo_ref[...], zero)
    out_up_ref[...] = jnp.maximum(up_ref[...], zero)


_LANE = 128
_TILE_BYTES = 1 << 20  # ~1 MiB per tile per ref (8 MiB total with double-buffering)


def _pick_lane_width(n):
    """Widest lane-dense last dim (multiple of 128) that divides n, or None."""
    for lanes in (1024, 512, 256, 128):
        if n % lanes == 0:
            return lanes
    return None


def _relu_pair_2d(lo2d, up2d):
    """Run the Pallas kernel over a lane-dense (rows, lanes) slab, tiled along rows."""
    rows, lanes = lo2d.shape
    itemsize = jnp.dtype(lo2d.dtype).itemsize
    # Packed-sublane multiple: 8 (f32), 16 (bf16/f16), 32 (int8/fp8).
    sub = 8 * max(1, 4 // itemsize)
    target_rows = max(sub, (_TILE_BYTES // (lanes * itemsize)) // sub * sub)
    rows_rounded = pl.cdiv(rows, sub) * sub
    tile_rows = min(target_rows, rows_rounded)
    grid = (pl.cdiv(rows, tile_rows),)

    spec = pl.BlockSpec((tile_rows, lanes), lambda i: (i, 0))
    out_shape = jax.ShapeDtypeStruct((rows, lanes), lo2d.dtype)
    n = rows * lanes

    return pl.pallas_call(
        _interval_relu_kernel,
        out_shape=(out_shape, out_shape),
        grid_spec=pltpu.PrefetchScalarGridSpec(
            num_scalar_prefetch=0,
            grid=grid,
            in_specs=[spec, spec],
            out_specs=[spec, spec],
        ),
        compiler_params=pltpu.CompilerParams(
            dimension_semantics=("parallel",),
            vmem_limit_bytes=32 << 20,
        ),
        cost_estimate=pl.CostEstimate(
            flops=2 * n,
            transcendentals=0,
            bytes_accessed=4 * n * itemsize,  # 2 inputs read + 2 outputs written
        ),
    )(lo2d, up2d)


def interval_relu(x: Interval) -> Interval:
    """Pallas-backed equivalent of IntervalReLU.forward."""
    lo, up = x.lower, x.upper
    assert lo.shape == up.shape and lo.dtype == up.dtype
    orig_shape = lo.shape
    n = lo.size

    lanes = _pick_lane_width(n)
    if lanes is not None:
        # Common case: zero extra HBM traffic — reshape is free for contiguous arrays.
        lo2d = lo.reshape(n // lanes, lanes)
        up2d = up.reshape(n // lanes, lanes)
        out_lo2d, out_up2d = _relu_pair_2d(lo2d, up2d)
        return Interval(out_lo2d.reshape(orig_shape), out_up2d.reshape(orig_shape))

    # Rare fallback: element count not divisible by 128 — pad minimally to a full
    # (8 x 128)-aligned slab, run, then un-pad. Value-preserving for ReLU.
    pad = (-n) % (8 * _LANE)
    lo_flat = jnp.pad(lo.reshape(-1), (0, pad))
    up_flat = jnp.pad(up.reshape(-1), (0, pad))
    rows = (n + pad) // _LANE
    out_lo2d, out_up2d = _relu_pair_2d(
        lo_flat.reshape(rows, _LANE), up_flat.reshape(rows, _LANE)
    )
    out_lo = out_lo2d.reshape(-1)[:n].reshape(orig_shape)
    out_up = out_up2d.reshape(-1)[:n].reshape(orig_shape)
    return Interval(out_lo, out_up)


if __name__ == "__main__":
    # Small NCHW example consistent with a conv-net interval-propagation setting.
    key = jax.random.PRNGKey(0)
    k_c, k_w = jax.random.split(key)
    N, C, H, W = 2, 4, 16, 16
    center = jax.random.normal(k_c, (N, C, H, W), dtype=jnp.float32)
    width = jnp.abs(jax.random.normal(k_w, (N, C, H, W), dtype=jnp.float32)) * 0.1
    x = Interval(center - width, center + width)

    y = interval_relu(x)
    jax.block_until_ready(y.lower)
    jax.block_until_ready(y.upper)

    # Correctness check vs. plain JAX reference of F.relu on both bounds.
    ref_lo = jnp.maximum(x.lower, 0.0)
    ref_up = jnp.maximum(x.upper, 0.0)
    assert y.lower.shape == (N, C, H, W) and y.upper.shape == (N, C, H, W)
    assert jnp.allclose(y.lower, ref_lo)
    assert jnp.allclose(y.upper, ref_up)
    # Interval ordering preserved after ReLU.
    assert bool(jnp.all(y.lower <= y.upper))

    print("KERNEL_OK")
</pallas_src>

<mosaic_0001>
module attributes {stable_mosaic.version = 11 : i64} {
  func.func @_interval_relu_kernel(%arg0: i32, %arg1: memref<8x1024xf32, #tpu.memory_space<vmem>>, %arg2: memref<8x1024xf32, #tpu.memory_space<vmem>>, %arg3: memref<8x1024xf32, #tpu.memory_space<vmem>>, %arg4: memref<8x1024xf32, #tpu.memory_space<vmem>>) attributes {dimension_semantics = [#tpu.dimension_semantics<parallel>], iteration_bounds = array<i64: 1>, scalar_prefetch = 0 : i64, scratch_operands = 0 : i64, tpu.core_type = #tpu.core_type<tc>, window_params = [{transform_indices = @transform_0, window_bounds = array<i64: 8, 1024>}, {transform_indices = @transform_1, window_bounds = array<i64: 8, 1024>}, {transform_indices = @transform_2, window_bounds = array<i64: 8, 1024>}, {transform_indices = @transform_3, window_bounds = array<i64: 8, 1024>}]} {
    %c0 = arith.constant 0 : index
    %c0_0 = arith.constant 0 : index
    %0 = vector.load %arg1[%c0, %c0_0] : memref<8x1024xf32, #tpu.memory_space<vmem>>, vector<8x1024xf32>
    %cst = arith.constant 0.000000e+00 : f32
    %1 = vector.broadcast %cst : f32 to vector<8x1024xf32>
    %2 = arith.maximumf %0, %1 : vector<8x1024xf32>
    %c0_1 = arith.constant 0 : index
    %c0_2 = arith.constant 0 : index
    %3 = vector.load %arg3[%c0_1, %c0_2] : memref<8x1024xf32, #tpu.memory_space<vmem>>, vector<8x1024xf32>
    tpu.vector_store %arg3[%c0_1, %c0_2], %2 {strides = array<i32>} : memref<8x1024xf32, #tpu.memory_space<vmem>>, vector<8x1024xf32>,
    %c0_3 = arith.constant 0 : index
    %c0_4 = arith.constant 0 : index
    %4 = vector.load %arg2[%c0_3, %c0_4] : memref<8x1024xf32, #tpu.memory_space<vmem>>, vector<8x1024xf32>
    %cst_5 = arith.constant 0.000000e+00 : f32
    %5 = vector.broadcast %cst_5 : f32 to vector<8x1024xf32>
    %6 = arith.maximumf %4, %5 : vector<8x1024xf32>
    %c0_6 = arith.constant 0 : index
    %c0_7 = arith.constant 0 : index
    %7 = vector.load %arg4[%c0_6, %c0_7] : memref<8x1024xf32, #tpu.memory_space<vmem>>, vector<8x1024xf32>
    tpu.vector_store %arg4[%c0_6, %c0_7], %6 {strides = array<i32>} : memref<8x1024xf32, #tpu.memory_space<vmem>>, vector<8x1024xf32>,
    return
  }
  func.func @transform_0(%arg0: i32) -> (i32, i32) {
    %c0_i32 = arith.constant 0 : i32
    %c0_i32_0 = arith.constant 0 : i32
    return %arg0, %c0_i32 : i32, i32
  }
  func.func @transform_1(%arg0: i32) -> (i32, i32) {
    %c0_i32 = arith.constant 0 : i32
    %c0_i32_0 = arith.constant 0 : i32
    return %arg0, %c0_i32 : i32, i32
  }
  func.func @transform_2(%arg0: i32) -> (i32, i32) {
    %c0_i32 = arith.constant 0 : i32
    %c0_i32_0 = arith.constant 0 : i32
    return %arg0, %c0_i32 : i32, i32
  }
  func.func @transform_3(%arg0: i32) -> (i32, i32) {
    %c0_i32 = arith.constant 0 : i32
    %c0_i32_0 = arith.constant 0 : i32
    return %arg0, %c0_i32 : i32, i32
  }
}

</mosaic_0001>

<bundles_post_ra>
// kernel: tpu_custom_call.1
= control target key start
LH: loop header
LB: loop body
LE: loop exit
PB: predicated region body
PF: predicated region fallthrough
CT: control target
= control target key end

     0   :  { %9 = vsyncpa [#allocation3], 0  ;;  %s293_s0 = inlined_call_operand.hbm [shape: f32[2,1024], index: 0, kind: input, shape index: {}]   ;;  %s294_s1 = inlined_call_operand.hbm [shape: f32[2,1024], index: 1, kind: input, shape index: {}]   ;;  %s295_s2 = inlined_call_operand.hbm [shape: f32[2,1024], index: 2, kind: output, shape index: {0}]   ;;  %s296_s3 = inlined_call_operand.hbm [shape: f32[2,1024], index: 3, kind: output, shape index: {1}]  }
   0x1   :  { %10 = vsyncpa [#allocation6], 0 }
   0x2   :  { %11 = vsyncpa [#allocation4], 0 }
   0x3   :  { %12 = vsyncpa [#allocation9], 0 }
   0x4   :  { %16 = vsyncadd [#allocation3], 768  ;;  %s17_s14 = sshll.u32 %s293_s0, 4  ;;  %s243_s15 = smov [#allocation2]   ;;  %s18_s14 = int_to_ptr.hbm [resolvable:$true] %s17_s14 }
   0x5   :  { %s19_s16 = sshll.u32 %s243_s15, 4  ;;  %s244_s17 = smov 256   ;;  %s20_s16 = int_to_ptr.vmem [resolvable:$true] %s19_s16 }
   0x6   :  { %s245_s18 = smov 16  }
   0x7   :  { %25 = dma.hbm_to_vmem [thread:$0]  %s18_s14, 256, %s20_s16, [#allocation3], %s244_s17, %s244_s17, %s245_s18  }
   0x8   :  { %29 = vsyncadd [#allocation6], 768  ;;  %s30_s21 = sshll.u32 %s294_s1, 4  ;;  %s246_s22 = smov [#allocation5]   ;;  %s31_s21 = int_to_ptr.hbm [resolvable:$true] %s30_s21 }
   0x9   :  { %s32_s23 = sshll.u32 %s246_s22, 4  ;;  %s33_s23 = int_to_ptr.vmem [resolvable:$true] %s32_s23 }
   0xa   :  { %38 = dma.hbm_to_vmem [thread:$0]  %s31_s21, 256, %s33_s23, [#allocation6], %s244_s17, %s244_s17, %s245_s18  }
   0xb   :  { %235 = dma.done.wait [#allocation3], 1024  }
   0xc   :  { %236 = vsyncadd [#allocation3], 4294966272 }
   0xd   :  { %237 = dma.done.wait [#allocation6], 1024  }
   0xe   :  { %238 = vsyncadd [#allocation6], 4294966272  ;;  %v47_v0 = vld [vmem:[#allocation2] sm:$0xff]  ;;  %v48_v1 = vld [vmem:[#allocation2 + $0x8] sm:$0xff] }
   0xf   :  { %v49_v2 = vld [vmem:[#allocation2 + $0x10] sm:$0xff]  ;;  %v55_v3 = vmax.f32 %v47_v0, 0.0  ;;  %v56_v4 = vmax.f32 %v48_v1, 0.0  ;;  %v50_v6 = vld [vmem:[#allocation2 + $0x18] sm:$0xff]  ;;  %v51_v7 = vld [vmem:[#allocation2 + $0x20] sm:$0xff] }
  0x10   :  { %v57_v5 = vmax.f32 %v49_v2, 0.0  ;;  %v52_v8 = vld [vmem:[#allocation2 + $0x28] sm:$0xff]  ;;  %v58_v9 = vmax.f32 %v50_v6, 0.0  ;;  %v53_v10 = vld [vmem:[#allocation2 + $0x30] sm:$0xff]  ;;  %v59_v11 = vmax.f32 %v51_v7, 0.0  ;;  %v54_v12 = vld [vmem:[#allocation2 + $0x38] sm:$0xff] }
  0x11   :  { %63 = vst [vmem:[#allocation7] sm:$0xff] %v55_v3  ;;  %v60_v13 = vmax.f32 %v52_v8, 0.0  ;;  %v71_v14 = vld [vmem:[#allocation5] sm:$0xff]  ;;  %v61_v15 = vmax.f32 %v53_v10, 0.0  ;;  %v72_v16 = vld [vmem:[#allocation5 + $0x8] sm:$0xff]  ;;  %v62_v17 = vmax.f32 %v54_v12, 0.0 }
  0x12   :  { %64 = vst [vmem:[#allocation7 + $0x8] sm:$0xff] %v56_v4  ;;  %v73_v18 = vld [vmem:[#allocation5 + $0x10] sm:$0xff]  ;;  %v79_v19 = vmax.f32 %v71_v14, 0.0  ;;  %v74_v20 = vld [vmem:[#allocation5 + $0x18] sm:$0xff]  ;;  %v80_v21 = vmax.f32 %v72_v16, 0.0  ;;  %v75_v22 = vld [vmem:[#allocation5 + $0x20] sm:$0xff] }
  0x13   :  { %65 = vst [vmem:[#allocation7 + $0x10] sm:$0xff] %v57_v5  ;;  %v81_v23 = vmax.f32 %v73_v18, 0.0  ;;  %v76_v24 = vld [vmem:[#allocation5 + $0x28] sm:$0xff]  ;;  %v82_v25 = vmax.f32 %v74_v20, 0.0  ;;  %v77_v26 = vld [vmem:[#allocation5 + $0x30] sm:$0xff]  ;;  %v83_v27 = vmax.f32 %v75_v22, 0.0 }
  0x14   :  { %66 = vst [vmem:[#allocation7 + $0x18] sm:$0xff] %v58_v9  ;;  %v78_v28 = vld [vmem:[#allocation5 + $0x38] sm:$0xff]  ;;  %v84_v29 = vmax.f32 %v76_v24, 0.0  ;;  %v85_v30 = vmax.f32 %v77_v26, 0.0 }
  0x15   :  { %67 = vst [vmem:[#allocation7 + $0x20] sm:$0xff] %v59_v11  ;;  %v86_v31 = vmax.f32 %v78_v28, 0.0 }
  0x16   :  { %68 = vst [vmem:[#allocation7 + $0x28] sm:$0xff] %v60_v13 }
  0x17   :  { %69 = vst [vmem:[#allocation7 + $0x30] sm:$0xff] %v61_v15 }
  0x18   :  { %70 = vst [vmem:[#allocation7 + $0x38] sm:$0xff] %v62_v17 }
  0x19   :  { %87 = vst [vmem:[#allocation8] sm:$0xff] %v79_v19 }
  0x1a   :  { %88 = vst [vmem:[#allocation8 + $0x8] sm:$0xff] %v80_v21 }
  0x1b   :  { %89 = vst [vmem:[#allocation8 + $0x10] sm:$0xff] %v81_v23 }
  0x1c   :  { %90 = vst [vmem:[#allocation8 + $0x18] sm:$0xff] %v82_v25 }
  0x1d   :  { %91 = vst [vmem:[#allocation8 + $0x20] sm:$0xff] %v83_v27 }
  0x1e   :  { %92 = vst [vmem:[#allocation8 + $0x28] sm:$0xff] %v84_v29 }
  0x1f   :  { %93 = vst [vmem:[#allocation8 + $0x30] sm:$0xff] %v85_v30 }
  0x20   :  { %94 = vst [vmem:[#allocation8 + $0x38] sm:$0xff] %v86_v31 }
  0x21   :  { %98 = vsyncadd [#allocation4], 768  ;;  %s101_s24 = sshll.u32 %s295_s2, 4  ;;  %s247_s25 = smov [#allocation7]   ;;  %s102_s24 = int_to_ptr.hbm [resolvable:$true] %s101_s24 }
  0x22   :  { %s99_s26 = sshll.u32 %s247_s25, 4  ;;  %s100_s26 = int_to_ptr.vmem [resolvable:$true] %s99_s26 }
  0x23   :  { %107 = dma.vmem_to_hbm [thread:$0]  %s100_s26, 256, %s102_s24, [#allocation4], %s244_s17, %s244_s17, %s245_s18  }
  0x24   :  { %111 = vsyncadd [#allocation9], 768  ;;  %s114_s29 = sshll.u32 %s296_s3, 4  ;;  %s248_s30 = smov [#allocation8]   ;;  %s115_s29 = int_to_ptr.hbm [resolvable:$true] %s114_s29 }
  0x25   :  { %s112_s4 = sshll.u32 %s248_s30, 4  ;;  %s113_s4 = int_to_ptr.vmem [resolvable:$true] %s112_s4 }
  0x26   :  { %120 = dma.vmem_to_hbm [thread:$0]  %s113_s4, 256, %s115_s29, [#allocation9], %s244_s17, %s244_s17, %s245_s18  }
  0x27   :  { %239 = dma.done.wait [#allocation4], 1024  }
  0x28   :  { %240 = vsyncadd [#allocation4], 4294966272 }
  0x29   :  { %241 = dma.done.wait [#allocation9], 1024  }
  0x2a   :  { %242 = vsyncadd [#allocation9], 4294966272 }
  0x2b   :  { %129 = vsyncpa [#allocation3], 1 }
  0x2c   :  { %130 = vsyncpa [#allocation6], 1 }
  0x2d   :  { %131 = vsyncpa [#allocation4], 1 }
  0x2e   :  { %132 = vsyncpa [#allocation9], 1 }

</bundles_post_ra>
